<compile_context>
chip_gen: v7x
topology: tpu7x:2x2x1
jax: 0.10.0
libtpu: 0.0.40
codegen_flags: <defaults>
</compile_context>

<pallas_src>
import jax
import jax.numpy as jnp
from jax.experimental import pallas as pl
from jax.experimental.pallas import tpu as pltpu


def _round_up(v, m):
    return ((v + m - 1) // m) * m


def mlp_kernel(b1_ref, b2_ref, x_ref, w1_ref, w2t_ref, o_ref):
    # b1_ref / b2_ref: (1,) f32 scalars in SMEM
    # x_ref:  (TB, in_p)   bf16
    # w1_ref: (in_p, hid_p) bf16
    # w2t_ref:(1, hid_p)   f32  (W2 transposed + zero-padded)
    # o_ref:  (TB, 1)      f32
    y = jnp.dot(x_ref[...], w1_ref[...], preferred_element_type=jnp.float32)
    z = jnp.maximum(y + b1_ref[0], 0.0)                       # relu(X@W1 + b1)
    # outputSize == 1: VPU multiply + lane reduce instead of an MXU matmul.
    y2 = jnp.sum(z * w2t_ref[...], axis=-1, keepdims=True) + b2_ref[0]
    o_ref[...] = y2.astype(o_ref.dtype)


def neural_network_forward(x, w1, w2, b1, b2):
    B, in_size = x.shape
    hid, out_size = w2.shape[0], w2.shape[1]
    assert w1.shape == (in_size, hid) and out_size == 1

    # Lane/sublane-friendly padded sizes.
    in_p = _round_up(in_size, 128)        # 206 -> 256
    hid_p = _round_up(hid, 128)           # 103 -> 128
    tb = 128 if B >= 128 else _round_up(B, 8)
    b_p = _round_up(B, tb)

    # Zero-pad operands; feed the MXU in bf16 (f32 accumulation in-kernel).
    x_p = jnp.zeros((b_p, in_p), jnp.bfloat16).at[:B, :in_size].set(
        x.astype(jnp.bfloat16))
    w1_p = jnp.zeros((in_p, hid_p), jnp.bfloat16).at[:in_size, :hid].set(
        w1.astype(jnp.bfloat16))
    # W2 as a (1, hid_p) row; padded hidden columns stay exactly zero.
    w2t = jnp.zeros((1, hid_p), jnp.float32).at[0, :hid].set(
        w2[:, 0].astype(jnp.float32))

    grid = (b_p // tb,)
    out_p = pl.pallas_call(
        mlp_kernel,
        out_shape=jax.ShapeDtypeStruct((b_p, 1), jnp.float32),
        grid=grid,
        in_specs=[
            pl.BlockSpec(memory_space=pltpu.MemorySpace.SMEM),      # b1 scalar
            pl.BlockSpec(memory_space=pltpu.MemorySpace.SMEM),      # b2 scalar
            pl.BlockSpec((tb, in_p), lambda i: (i, 0)),             # X tile
            pl.BlockSpec((in_p, hid_p), lambda i: (0, 0)),          # W1 (resident)
            pl.BlockSpec((1, hid_p), lambda i: (0, 0)),             # W2^T (resident)
        ],
        out_specs=pl.BlockSpec((tb, 1), lambda i: (i, 0)),
        compiler_params=pltpu.CompilerParams(
            dimension_semantics=("parallel",)),
    )(b1, b2, x_p, w1_p, w2t)

    return out_p[:B]


def reference_forward(x, w1, w2, b1, b2):
    y = jnp.matmul(x, w1) + b1[0]
    z = jnp.maximum(y, 0.0)
    return jnp.matmul(z, w2) + b2[0]


if __name__ == "__main__":
    input_size, hidden_size, output_size = 206, 103, 1
    batch = 8

    key = jax.random.PRNGKey(0)
    k_x, k_w1, k_w2, k_b1, k_b2 = jax.random.split(key, 5)

    # Parameter init matching the module's __init__ distributions:
    # W1, W2 ~ Normal(0, 1); b1, b2 ~ Uniform[0, 1) scalars.
    x = jax.random.normal(k_x, (batch, input_size), dtype=jnp.float32)
    w1 = jax.random.normal(k_w1, (input_size, hidden_size), dtype=jnp.float32)
    w2 = jax.random.normal(k_w2, (hidden_size, output_size), dtype=jnp.float32)
    b1 = jax.random.uniform(k_b1, (1,), dtype=jnp.float32)
    b2 = jax.random.uniform(k_b2, (1,), dtype=jnp.float32)

    out = neural_network_forward(x, w1, w2, b1, b2)
    out = jax.block_until_ready(out)

    ref = reference_forward(x, w1, w2, b1, b2)
    assert out.shape == (batch, output_size)
    # bf16 first-matmul inputs: check normalized max error (f32 ref).
    rel_err = jnp.max(jnp.abs(out - ref)) / (jnp.max(jnp.abs(ref)) + 1e-6)
    assert rel_err < 2e-2, f"relative error too large: {rel_err}"

    print("KERNEL_OK")
</pallas_src>

<mosaic_0001>
module attributes {stable_mosaic.version = 11 : i64} {
  func.func @mlp_kernel(%arg0: i32, %arg1: memref<1xf32, #tpu.memory_space<smem>>, %arg2: memref<1xf32, #tpu.memory_space<smem>>, %arg3: memref<8x256xbf16, #tpu.memory_space<vmem>>, %arg4: memref<256x128xbf16, #tpu.memory_space<vmem>>, %arg5: memref<1x128xf32, #tpu.memory_space<vmem>>, %arg6: memref<8x1xf32, #tpu.memory_space<vmem>>) attributes {dimension_semantics = [#tpu.dimension_semantics<parallel>], iteration_bounds = array<i64: 1>, scalar_prefetch = 0 : i64, scratch_operands = 0 : i64, tpu.core_type = #tpu.core_type<tc>, window_params = [{transform_indices = @transform_0, window_bounds = array<i64: 1>}, {transform_indices = @transform_1, window_bounds = array<i64: 1>}, {transform_indices = @transform_2, window_bounds = array<i64: 8, 256>}, {pipeline_mode = #tpu.pipeline_mode<synchronous>, transform_indices = @transform_3, window_bounds = array<i64: 256, 128>}, {pipeline_mode = #tpu.pipeline_mode<synchronous>, transform_indices = @transform_4, window_bounds = array<i64: 1, 128>}, {transform_indices = @transform_5, window_bounds = array<i64: 8, 1>}]} {
    %c0 = arith.constant 0 : index
    %c0_0 = arith.constant 0 : index
    %0 = vector.load %arg3[%c0, %c0_0] : memref<8x256xbf16, #tpu.memory_space<vmem>>, vector<8x256xbf16>
    %c0_1 = arith.constant 0 : index
    %c0_2 = arith.constant 0 : index
    %1 = vector.load %arg4[%c0_1, %c0_2] : memref<256x128xbf16, #tpu.memory_space<vmem>>, vector<256x128xbf16>
    %cst = arith.constant dense<0.000000e+00> : vector<8x128xf32>
    %2 = tpu.matmul %0, %1, %cst {dimension_numbers = #tpu.dot_dimension_numbers<[1], [0], [0], [1], [0, 0, 1, 1], [], []>} : vector<8x256xbf16>, vector<256x128xbf16>, vector<8x128xf32> -> vector<8x128xf32>
    %c0_3 = arith.constant 0 : index
    %3 = memref.load %arg1[%c0_3] : memref<1xf32, #tpu.memory_space<smem>>
    %4 = vector.broadcast %3 : f32 to vector<8x128xf32>
    %5 = arith.addf %2, %4 : vector<8x128xf32>
    %cst_4 = arith.constant 0.000000e+00 : f32
    %6 = vector.broadcast %cst_4 : f32 to vector<8x128xf32>
    %7 = arith.maximumf %5, %6 : vector<8x128xf32>
    %c0_5 = arith.constant 0 : index
    %c0_6 = arith.constant 0 : index
    %8 = vector.load %arg5[%c0_5, %c0_6] : memref<1x128xf32, #tpu.memory_space<vmem>>, vector<1x128xf32>
    %9 = vector.broadcast %8 : vector<1x128xf32> to vector<8x128xf32>
    %10 = arith.mulf %7, %9 : vector<8x128xf32>
    %cst_7 = arith.constant dense<0.000000e+00> : vector<8xf32>
    %11 = vector.multi_reduction <add>, %10, %cst_7 [1] : vector<8x128xf32> to vector<8xf32>
    %12 = vector.shape_cast %11 : vector<8xf32> to vector<8x1xf32>
    %c0_8 = arith.constant 0 : index
    %13 = memref.load %arg2[%c0_8] : memref<1xf32, #tpu.memory_space<smem>>
    %14 = vector.broadcast %13 : f32 to vector<8x1xf32>
    %15 = arith.addf %12, %14 : vector<8x1xf32>
    %c0_9 = arith.constant 0 : index
    %c0_10 = arith.constant 0 : index
    %16 = vector.load %arg6[%c0_9, %c0_10] : memref<8x1xf32, #tpu.memory_space<vmem>>, vector<8x1xf32>
    tpu.vector_store %arg6[%c0_9, %c0_10], %15 {strides = array<i32>} : memref<8x1xf32, #tpu.memory_space<vmem>>, vector<8x1xf32>,
    return
  }
  func.func @transform_0(%arg0: i32) -> i32 {
    %c0_i32 = arith.constant 0 : i32
    %c0_i32_0 = arith.constant 0 : i32
    return %c0_i32 : i32
  }
  func.func @transform_1(%arg0: i32) -> i32 {
    %c0_i32 = arith.constant 0 : i32
    %c0_i32_0 = arith.constant 0 : i32
    return %c0_i32 : i32
  }
  func.func @transform_2(%arg0: i32) -> (i32, i32) {
    %c0_i32 = arith.constant 0 : i32
    %c0_i32_0 = arith.constant 0 : i32
    return %arg0, %c0_i32 : i32, i32
  }
  func.func @transform_3(%arg0: i32) -> (i32, i32) {
    %c0_i32 = arith.constant 0 : i32
    %c0_i32_0 = arith.constant 0 : i32
    %c0_i32_1 = arith.constant 0 : i32
    return %c0_i32, %c0_i32_0 : i32, i32
  }
  func.func @transform_4(%arg0: i32) -> (i32, i32) {
    %c0_i32 = arith.constant 0 : i32
    %c0_i32_0 = arith.constant 0 : i32
    %c0_i32_1 = arith.constant 0 : i32
    return %c0_i32, %c0_i32_0 : i32, i32
  }
  func.func @transform_5(%arg0: i32) -> (i32, i32) {
    %c0_i32 = arith.constant 0 : i32
    %c0_i32_0 = arith.constant 0 : i32
    return %arg0, %c0_i32 : i32, i32
  }
}

</mosaic_0001>

<bundles_post_ra>
// kernel: tpu_custom_call.1
= control target key start
LH: loop header
LB: loop body
LE: loop exit
PB: predicated region body
PF: predicated region fallthrough
CT: control target
= control target key end

     0   :  { %12 = vsyncpa [#allocation5], 0  ;;  %s437_s0 = inlined_call_operand.<no memory space> [shape: f32[1], index: 0, kind: input, shape index: {}]   ;;  %s438_s1 = inlined_call_operand.<no memory space> [shape: f32[1], index: 1, kind: input, shape index: {}]   ;;  %s439_s2 = inlined_call_operand.hbm [shape: bf16[8,256], index: 2, kind: input, shape index: {}]   ;;  %s440_s3 = inlined_call_operand.hbm [shape: bf16[256,128], index: 3, kind: input, shape index: {}]   ;;  %s441_s4 = inlined_call_operand.vmem [shape: f32[1,128], index: 4, kind: input, shape index: {}]   ;;  %s442_s5 = inlined_call_operand.vmem [shape: f32[8,1], index: 5, kind: output, shape index: {}]  }
   0x1   :  { %13 = vsyncpa [#allocation7], 0  ;;  %s360_s18 = smov [#allocation4]   ;;  %s361_s20 = smov [#allocation6]  }
   0x2   :  { %s24_s19 = sshll.u32 %s360_s18, 4  ;;  %s33_s21 = sshll.u32 %s361_s20, 4  ;;  %s25_s19 = int_to_ptr.vmem [resolvable:$true] %s24_s19  ;;  %s394_s21 = int_to_ptr.vmem [resolvable:$true] %s33_s21 }
   0x3   :  { %s312_s24 = scalar_lea.hbm %s439_s2, 128 }
   0x4   :  { %p313_p0 = scmp.ne.s32.totalorder %s439_s2, %s312_s24  ;;  %p316_p1 = scmp.lt.u32.totalorder %s312_s24, %s439_s2 }
   0x6   :  { %p318_p2 = pnand %p316_p1, %p313_p0 }
   0x8   :  { %321 = shalt.err (!%p318_p2)
}
   0x9   :  { %s322_s29 = scalar_lea.vmem %s25_s19, 128  ;;  %p327_p4 = scmp.lt.s32.totalorder %s25_s19, %s25_s19 }
   0xa   :  { %p323_p3 = scmp.ne.s32.totalorder %s25_s19, %s322_s29  ;;  %p328_p5 = scmp.lt.s32.totalorder %s322_s29, %s322_s29 }
   0xc   :  { %p329_p6 = por %p328_p5, %p327_p4 }
   0xe   :  { %p330_p7 = pnand %p329_p6, %p323_p3 }
  0x10   :  { %333 = shalt.err (!%p330_p7)
}
  0x11   :  { %27 = dma.hbm_to_vmem [thread:$0]  %s439_s2, 128, %s25_s19, [#allocation5]  }
  0x12   :  { %s334_s9 = scalar_lea.hbm %s440_s3, 2048 }
  0x13   :  { %p335_p8 = scmp.ne.s32.totalorder %s440_s3, %s334_s9  ;;  %p338_p9 = scmp.lt.u32.totalorder %s334_s9, %s440_s3 }
  0x15   :  { %p340_p10 = pnand %p338_p9, %p335_p8 }
  0x17   :  { %343 = shalt.err (!%p340_p10)
}
  0x18   :  { %s344_s14 = scalar_lea.vmem %s394_s21, 2048  ;;  %p349_p12 = scmp.lt.s32.totalorder %s394_s21, %s394_s21 }
  0x19   :  { %p345_p11 = scmp.ne.s32.totalorder %s394_s21, %s344_s14  ;;  %p350_p13 = scmp.lt.s32.totalorder %s344_s14, %s344_s14 }
  0x1b   :  { %p351_p0 = por %p350_p13, %p349_p12 }
  0x1d   :  { %p352_p1 = pnand %p351_p0, %p345_p11 }
  0x1f   :  { %355 = shalt.err (!%p352_p1)
}
  0x20   :  { %s362_s2 = smov 64   ;;  %s363_s15 = smov 4  }
  0x21   :  { %39 = dma.hbm_to_vmem [thread:$0]  %s440_s3, 2048, %s394_s21, [#allocation7], %s362_s2, %s362_s2, %s363_s15  }
  0x22   :  { %356 = dma.done.wait [#allocation5], 128  }
  0x23   :  { %357 = vsyncadd [#allocation5], 4294967168 }
  0x24   :  { %358 = dma.done.wait [#allocation7], 2048  }
  0x25   :  { %359 = vsyncadd [#allocation7], 4294965248  ;;  %v294_v0 = vld [vmem:[#allocation6 + $0x40] sm:$0xff]   ;;  %v296_v2 = vld [vmem:[#allocation6 + $0x48] sm:$0xff]   ;;  %v83_v21 = vstv %s437_s0  ;;  %v239_v29 = vstv %s438_s1  ;;  %vm241_vm0 = vcmask 7168  }
  0x26   :  { %v295_v1 = vld [vmem:[#allocation6] sm:$0xff]   ;;  %268 = vmatprep.subr.bf16.mxu0 %v294_v0  ;;  %v297_v3 = vld [vmem:[#allocation6 + $0x8] sm:$0xff]   ;;  %v298_v4 = vld [vmem:[#allocation6 + $0x50] sm:$0xff]  }
  0x27   :  { %269 = vmatpush3.bf16.msra.mxu0 %v295_v1  ;;  %v299_v5 = vld [vmem:[#allocation6 + $0x10] sm:$0xff]   ;;  %v300_v6 = vld [vmem:[#allocation6 + $0x58] sm:$0xff]   ;;  %v302_v8 = vld [vmem:[#allocation6 + $0x60] sm:$0xff]  }
  0x28   :  { %270 = vmatprep.subr.bf16.mxu0 %v296_v2  ;;  %v301_v7 = vld [vmem:[#allocation6 + $0x18] sm:$0xff]   ;;  %v303_v9 = vld [vmem:[#allocation6 + $0x20] sm:$0xff]   ;;  %v304_v10 = vld [vmem:[#allocation6 + $0x68] sm:$0xff]  }
  0x29   :  { %v49_v11 = vld [vmem:[#allocation4] sm:$0xff]  ;;  %v305_v13 = vld [vmem:[#allocation6 + $0x28] sm:$0xff]   ;;  %v306_v14 = vld [vmem:[#allocation6 + $0x70] sm:$0xff]  }
  0x2a   :  { %v250_v12 = vcombine.high %v49_v11, %v49_v11  ;;  %v307_v15 = vld [vmem:[#allocation6 + $0x30] sm:$0xff]   ;;  %v308_v16 = vld [vmem:[#allocation6 + $0x78] sm:$0xff]   ;;  %v249_v18 = vcombine.low %v49_v11, %v49_v11 }
  0x2b   :  { %271 = vmatpush3.bf16.msra.mxu0 %v297_v3  ;;  %v309_v17 = vld [vmem:[#allocation6 + $0x38] sm:$0xff]  }
  0x2c   :  { %272 = vmatprep.subr.bf16.mxu0 %v298_v4  ;;  %219 = vmatprep.mubr.bf16.mxu0 %v250_v12  ;;  %v267_v26 = vld [vmem:[%s441_s4] ss:$0 sm:$0xff] }
  0x2f   :  { %273 = vmatpush3.bf16.msra.mxu0 %v299_v5 }
  0x30   :  { %274 = vmatprep.subr.bf16.mxu0 %v300_v6 }
  0x33   :  { %275 = vmatpush3.bf16.msra.mxu0 %v301_v7 }
  0x34   :  { %276 = vmatprep.subr.bf16.mxu0 %v302_v8 }
  0x37   :  { %277 = vmatpush3.bf16.msra.mxu0 %v303_v9 }
  0x38   :  { %278 = vmatprep.subr.bf16.mxu0 %v304_v10 }
  0x3b   :  { %279 = vmatpush3.bf16.msra.mxu0 %v305_v13 }
  0x3c   :  { %280 = vmatprep.subr.bf16.mxu0 %v306_v14 }
  0x3f   :  { %281 = vmatpush3.bf16.msra.mxu0 %v307_v15 }
  0x40   :  { %282 = vmatprep.subr.bf16.mxu0 %v308_v16 }
  0x43   :  { %283 = vmatpush3.bf16.msra.mxu0 %v309_v17 }
  0x46   :  { %220 = vmatmul.mubr.bf16.vlgmr.msra.gmra.mrb[0].mxu0 %v249_v18 }
 0x119   :  { %v284_v19 = vpop.f32.mrb[0].mxu0 }
 0x11a   :  { %v285_v20 = vpop.f32.mrb[1].mxu0 }
 0x11b   :  { %v286_v22 = vadd.f32 %v285_v20, %v284_v19  ;;  %v287_v23 = vpop.f32.mrb[2].mxu0 }
 0x11c   :  { %v288_v24 = vpop.f32.mrb[3].mxu0 }
 0x11d   :  { %v222_v25 = vadd.f32 %v286_v22, %v83_v21 }
 0x11f   :  { %v227_v27 = vmax.f32 %v222_v25, 0.0 }
 0x121   :  { %v235_v28 = vmul.f32 %v267_v26, %v227_v27 }
 0x123   :  { %236 = vadd.xlane.f32.xlu0 %v235_v28 }
 0x1b0   :  { %v237_v30 = vpop.xlane.xlu0 %236 }
 0x1b1   :  { %v240_v31 = vadd.f32 %v239_v29, %v237_v30 }
 0x1b3   :  { %242 = vst.msk [vmem:[%s442_s5] sm:$0xff] %vm241_vm0, %v240_v31 }
 0x1b4   :  { %247 = vsyncpa [#allocation5], 1 }
 0x1b5   :  { %248 = vsyncpa [#allocation7], 1 }

</bundles_post_ra>
